<compile_context>
chip_gen: v7x
topology: tpu7x:2x2x1
jax: 0.10.0
libtpu: 0.0.40
codegen_flags: <defaults>
</compile_context>

<pallas_src>
import jax
import jax.numpy as jnp
from jax.experimental import pallas as pl
from jax.experimental.pallas import tpu as pltpu


def _pick_hw_tile(hw, c, itemsize, max_hw_tile=None, budget_bytes=2 * 1024 * 1024):
    """Largest multiple-of-128 divisor of `hw` whose (C, tile) block fits the budget."""
    if max_hw_tile is None:
        max_hw_tile = hw
    lane_cap = min(hw, max_hw_tile, max(128, budget_bytes // max(1, c * itemsize)))
    best = None
    t = 128
    while t <= lane_cap:
        if hw % t == 0:
            best = t
        t += 128
    # Fallback: full spatial extent (always a legal block dim).
    return best if best is not None else hw


def _pool_kernel(x_ref, sum_ref, max_ref):
    # x_ref block: (1, C, THW); sum_ref / max_ref blocks: (1, C, 1), resident across t.
    @pl.when(pl.program_id(1) == 0)
    def _():
        sum_ref[...] = jnp.zeros(sum_ref.shape, sum_ref.dtype)
        max_ref[...] = jnp.full(max_ref.shape, -jnp.inf, max_ref.dtype)

    x = x_ref[0, :, :]                                   # (C, THW), input dtype
    # Accumulate the spatial sum in f32 (safe for bf16 inputs / large H*W).
    sum_ref[0, :, :] = sum_ref[0, :, :] + jnp.sum(
        x.astype(jnp.float32), axis=-1, keepdims=True)
    max_ref[0, :, :] = jnp.maximum(
        max_ref[0, :, :],
        jnp.max(x, axis=-1, keepdims=True).astype(jnp.float32))


def _scale_kernel(x_ref, scale_ref, o_ref):
    # x_ref / o_ref blocks: (1, C, THW); scale_ref block: (1, C, 1) broadcast over lanes.
    o_ref[0, :, :] = x_ref[0, :, :] * scale_ref[0, :, :]


def channel_attention_pallas(x_nchw, w1, b1, w2, b2, *, max_hw_tile=None):
    """ChannelAttention forward.

    x_nchw: (B, C, H, W); w1: (C, Cr), b1: (Cr,), w2: (Cr, C), b2: (C,)
    (1x1 convs stored as channel-wise (Cin, Cout) linear maps). Returns (B, C, H, W).
    """
    B, C, H, W = x_nchw.shape
    HW = H * W
    x = x_nchw.reshape(B, C, HW)                         # free reshape, no data movement
    thw = _pick_hw_tile(HW, C, x.dtype.itemsize, max_hw_tile)
    n_t = HW // thw

    # ---- Pass 1: per-channel spatial sum & max (resident accumulators over HW tiles).
    sum_out, max_out = pl.pallas_call(
        _pool_kernel,
        out_shape=(jax.ShapeDtypeStruct((B, C, 1), jnp.float32),
                   jax.ShapeDtypeStruct((B, C, 1), jnp.float32)),
        grid_spec=pltpu.PrefetchScalarGridSpec(
            num_scalar_prefetch=0,
            grid=(B, n_t),
            in_specs=[pl.BlockSpec((1, C, thw), lambda b, t: (b, 0, t))],
            out_specs=(pl.BlockSpec((1, C, 1), lambda b, t: (b, 0, 0)),
                       pl.BlockSpec((1, C, 1), lambda b, t: (b, 0, 0)))),
        compiler_params=pltpu.CompilerParams(
            dimension_semantics=("parallel", "arbitrary"),
            vmem_limit_bytes=32 * 1024 * 1024),
    )(x)

    # ---- Tiny squeeze-excite MLP on the pooled stats, hoisted to plain JAX.
    # fc1(avg) + fc1(max) == (avg + max) @ w1 + 2*b1 by linearity (bias in both branches).
    avg = sum_out[:, :, 0] * (1.0 / HW)                  # (B, C) f32
    mx = max_out[:, :, 0]                                # (B, C) f32
    h = jnp.maximum(
        (avg + mx) @ w1.astype(jnp.float32) + 2.0 * b1.astype(jnp.float32), 0.0)
    s = h @ w2.astype(jnp.float32) + b2.astype(jnp.float32)
    scale = jax.nn.sigmoid(s).astype(x.dtype).reshape(B, C, 1)

    # ---- Pass 2: broadcast the per-channel scale over the (lane-dense) HW axis.
    out = pl.pallas_call(
        _scale_kernel,
        out_shape=jax.ShapeDtypeStruct((B, C, HW), x.dtype),
        grid_spec=pltpu.PrefetchScalarGridSpec(
            num_scalar_prefetch=0,
            grid=(B, n_t),
            in_specs=[pl.BlockSpec((1, C, thw), lambda b, t: (b, 0, t)),
                      pl.BlockSpec((1, C, 1), lambda b, t: (b, 0, 0))],
            out_specs=pl.BlockSpec((1, C, thw), lambda b, t: (b, 0, t))),
        compiler_params=pltpu.CompilerParams(
            dimension_semantics=("parallel", "parallel"),
            vmem_limit_bytes=32 * 1024 * 1024),
    )(x, scale)

    return out.reshape(B, C, H, W)


def channel_attention_ref(x, w1, b1, w2, b2):
    """Pure-JAX reference matching the PyTorch forward (NCHW)."""
    avg_pool = jnp.mean(x, axis=(2, 3), keepdims=True)
    max_pool = jnp.max(jnp.max(x, axis=2, keepdims=True), axis=3, keepdims=True)

    def fc(v, w, b):  # 1x1 conv == channel-wise linear; w: (Cin, Cout), b: (Cout,)
        return jnp.einsum('bchw,cd->bdhw', v, w) + b[None, :, None, None]

    s = fc(avg_pool, w1, b1) + fc(max_pool, w1, b1)
    s = fc(jnp.maximum(s, 0.0), w2, b2)
    return jax.nn.sigmoid(s) * x


if __name__ == "__main__":
    # Small shapes consistent with the module (channels must be >= reduction).
    B, C, H, W = 2, 32, 16, 16
    reduction = 16
    Cr = C // reduction  # = 2

    key = jax.random.PRNGKey(0)
    kx, k1, kb1, k2, kb2 = jax.random.split(key, 5)

    x = jax.random.normal(kx, (B, C, H, W), dtype=jnp.float32)
    w1 = 0.1 * jax.random.normal(k1, (C, Cr), dtype=jnp.float32)
    b1 = 0.1 * jax.random.normal(kb1, (Cr,), dtype=jnp.float32)
    w2 = 0.1 * jax.random.normal(k2, (Cr, C), dtype=jnp.float32)
    b2 = 0.1 * jax.random.normal(kb2, (C,), dtype=jnp.float32)

    ref = channel_attention_ref(x, w1, b1, w2, b2)

    # Default tiling (single HW tile at this small shape).
    out = jax.block_until_ready(channel_attention_pallas(x, w1, b1, w2, b2))
    assert out.shape == (B, C, H, W)
    assert jnp.allclose(out, ref, atol=1e-5, rtol=1e-5), "mismatch (default tiling)"

    # Forced multi-tile path: exercises the resident sum/max accumulators across HW tiles.
    out_t = jax.block_until_ready(
        channel_attention_pallas(x, w1, b1, w2, b2, max_hw_tile=128))
    assert jnp.allclose(out_t, ref, atol=1e-5, rtol=1e-5), "mismatch (tiled HW)"

    print("KERNEL_OK")
</pallas_src>

<mosaic_0001>
module attributes {stable_mosaic.version = 11 : i64} {
  func.func @_pool_kernel(%arg0: i32, %arg1: i32, %arg2: memref<1x32x256xf32, #tpu.memory_space<vmem>>, %arg3: memref<1x32x1xf32, #tpu.memory_space<vmem>>, %arg4: memref<1x32x1xf32, #tpu.memory_space<vmem>>) attributes {dimension_semantics = [#tpu.dimension_semantics<parallel>, #tpu.dimension_semantics<arbitrary>], iteration_bounds = array<i64: 2, 1>, scalar_prefetch = 0 : i64, scratch_operands = 0 : i64, tpu.core_type = #tpu.core_type<tc>, window_params = [{transform_indices = @transform_0, window_bounds = array<i64: 1, 32, 256>}, {transform_indices = @transform_1, window_bounds = array<i64: 1, 32, 1>}, {transform_indices = @transform_2, window_bounds = array<i64: 1, 32, 1>}]} {
    %c0_i32 = arith.constant 0 : i32
    %0 = arith.cmpi eq, %arg1, %c0_i32 : i32
    %1 = arith.extui %0 : i1 to i32
    %c0_i32_0 = arith.constant 0 : i32
    %2 = arith.cmpi ne, %1, %c0_i32_0 : i32
    scf.if %2 {
      %cst_16 = arith.constant 0.000000e+00 : f32
      %21 = vector.broadcast %cst_16 : f32 to vector<1x32x1xf32>
      %c0_17 = arith.constant 0 : index
      %c0_18 = arith.constant 0 : index
      %c0_19 = arith.constant 0 : index
      %22 = vector.load %arg3[%c0_17, %c0_18, %c0_19] : memref<1x32x1xf32, #tpu.memory_space<vmem>>, vector<1x32x1xf32>
      tpu.vector_store %arg3[%c0_17, %c0_18, %c0_19], %21 {strides = array<i32>} : memref<1x32x1xf32, #tpu.memory_space<vmem>>, vector<1x32x1xf32>,
      %cst_20 = arith.constant 0xFF800000 : f32
      %23 = vector.broadcast %cst_20 : f32 to vector<1x32x1xf32>
      %c0_21 = arith.constant 0 : index
      %c0_22 = arith.constant 0 : index
      %c0_23 = arith.constant 0 : index
      %24 = vector.load %arg4[%c0_21, %c0_22, %c0_23] : memref<1x32x1xf32, #tpu.memory_space<vmem>>, vector<1x32x1xf32>
      tpu.vector_store %arg4[%c0_21, %c0_22, %c0_23], %23 {strides = array<i32>} : memref<1x32x1xf32, #tpu.memory_space<vmem>>, vector<1x32x1xf32>,
    } else {
    }
    %c0 = arith.constant 0 : index
    %c0_1 = arith.constant 0 : index
    %c0_2 = arith.constant 0 : index
    %3 = vector.load %arg2[%c0, %c0_1, %c0_2] : memref<1x32x256xf32, #tpu.memory_space<vmem>>, vector<1x32x256xf32>
    %4 = vector.shape_cast %3 : vector<1x32x256xf32> to vector<32x256xf32>
    %c0_3 = arith.constant 0 : index
    %c0_4 = arith.constant 0 : index
    %c0_5 = arith.constant 0 : index
    %5 = vector.load %arg3[%c0_3, %c0_4, %c0_5] : memref<1x32x1xf32, #tpu.memory_space<vmem>>, vector<1x32x1xf32>
    %6 = vector.shape_cast %5 : vector<1x32x1xf32> to vector<32x1xf32>
    %cst = arith.constant dense<0.000000e+00> : vector<32xf32>
    %7 = vector.multi_reduction <add>, %4, %cst [1] : vector<32x256xf32> to vector<32xf32>
    %8 = vector.shape_cast %7 : vector<32xf32> to vector<32x1xf32>
    %9 = arith.addf %6, %8 : vector<32x1xf32>
    %c0_6 = arith.constant 0 : index
    %c0_7 = arith.constant 0 : index
    %c0_8 = arith.constant 0 : index
    %10 = vector.load %arg3[%c0_6, %c0_7, %c0_8] : memref<1x32x1xf32, #tpu.memory_space<vmem>>, vector<1x32x1xf32>
    %11 = vector.shape_cast %10 : vector<1x32x1xf32> to vector<32x1xf32>
    %12 = vector.shape_cast %9 : vector<32x1xf32> to vector<1x32x1xf32>
    tpu.vector_store %arg3[%c0_6, %c0_7, %c0_8], %12 {strides = array<i32>} : memref<1x32x1xf32, #tpu.memory_space<vmem>>, vector<1x32x1xf32>,
    %c0_9 = arith.constant 0 : index
    %c0_10 = arith.constant 0 : index
    %c0_11 = arith.constant 0 : index
    %13 = vector.load %arg4[%c0_9, %c0_10, %c0_11] : memref<1x32x1xf32, #tpu.memory_space<vmem>>, vector<1x32x1xf32>
    %14 = vector.shape_cast %13 : vector<1x32x1xf32> to vector<32x1xf32>
    %cst_12 = arith.constant dense<0xFF800000> : vector<32xf32>
    %15 = vector.multi_reduction <maximumf>, %4, %cst_12 [1] : vector<32x256xf32> to vector<32xf32>
    %16 = vector.shape_cast %15 : vector<32xf32> to vector<32x1xf32>
    %17 = arith.maximumf %14, %16 : vector<32x1xf32>
    %c0_13 = arith.constant 0 : index
    %c0_14 = arith.constant 0 : index
    %c0_15 = arith.constant 0 : index
    %18 = vector.load %arg4[%c0_13, %c0_14, %c0_15] : memref<1x32x1xf32, #tpu.memory_space<vmem>>, vector<1x32x1xf32>
    %19 = vector.shape_cast %18 : vector<1x32x1xf32> to vector<32x1xf32>
    %20 = vector.shape_cast %17 : vector<32x1xf32> to vector<1x32x1xf32>
    tpu.vector_store %arg4[%c0_13, %c0_14, %c0_15], %20 {strides = array<i32>} : memref<1x32x1xf32, #tpu.memory_space<vmem>>, vector<1x32x1xf32>,
    return
  }
  func.func @transform_0(%arg0: i32, %arg1: i32) -> (i32, i32, i32) {
    %c0_i32 = arith.constant 0 : i32
    %c0_i32_0 = arith.constant 0 : i32
    return %arg0, %c0_i32, %arg1 : i32, i32, i32
  }
  func.func @transform_1(%arg0: i32, %arg1: i32) -> (i32, i32, i32) {
    %c0_i32 = arith.constant 0 : i32
    %c0_i32_0 = arith.constant 0 : i32
    %c0_i32_1 = arith.constant 0 : i32
    return %arg0, %c0_i32, %c0_i32_0 : i32, i32, i32
  }
  func.func @transform_2(%arg0: i32, %arg1: i32) -> (i32, i32, i32) {
    %c0_i32 = arith.constant 0 : i32
    %c0_i32_0 = arith.constant 0 : i32
    %c0_i32_1 = arith.constant 0 : i32
    return %arg0, %c0_i32, %c0_i32_0 : i32, i32, i32
  }
}

</mosaic_0001>

<bundles_post_ra>
// kernel: tpu_custom_call.1
= control target key start
LH: loop header
LB: loop body
LE: loop exit
PB: predicated region body
PF: predicated region fallthrough
CT: control target
= control target key end

     0   :  { %8 = vsyncpa [#allocation3], 0  ;;  %s732_s0 = inlined_call_operand.hbm [shape: f32[2,32,256], index: 0, kind: input, shape index: {}]   ;;  %s733_s1 = inlined_call_operand.vmem [shape: f32[2,32,1], index: 1, kind: output, shape index: {0}]   ;;  %s734_s2 = inlined_call_operand.vmem [shape: f32[2,32,1], index: 2, kind: output, shape index: {1}]  }
   0x1   :  { %10 = vsyncpa [#allocation3 + $0x1], 0  ;;  %s554_s9 = smov 0   ;;  %s556_s10 = smov 0  }
   0x2   :  { %s558_s11 = smov 0   ;;  %s560_s12 = smov 0  }
   0x3   :  { %s562_s13 = smov 0   ;;  %s564_s14 = smov 0  }
   0x4 LB: > { %s375_s15 = sadd.s32 4294967295, %s532_s14   ;;  %s28_s16 = sadd.s32 1, %s528_s13  ;;  %s532_s14 = sphi %s564_s14, %s16_s14   ;;  %s528_s13 = sphi %s562_s13, %s742_s13   ;;  %s524_s12 = sphi %s560_s12, %s741_s12   ;;  %s520_s11 = sphi %s558_s11, %s740_s11   ;;  %s516_s10 = sphi %s556_s10, %s739_s10   ;;  %s512_s9 = sphi %s554_s9, %s738_s9  }
   0x5   : > { %p30_p0 = scmp.ge.s32.totalorder %s28_s16, 2  ;;  %s37_s17 = sadd.s32 1, %s520_s11 }
   0x6   : > { %p44_p1 = scmp.ne.s32.totalorder %s520_s11, %s516_s10  ;;  %p45_p2 = scmp.eq.s32.totalorder %s532_s14, 0 }
   0x7   : > { %s744_s16 = smov (%p30_p0, %s28_s16), 0  ;;  %p50_p4 = scmp.ne.s32.totalorder %s516_s10, %s512_s9 }
   0x8   : > { %p590_p3 = por %p45_p2, %p44_p1  ;;  %s32_s19 = ssub.s32 %s528_s13, %s744_s16 }
   0x9   : > { %p51_p5 = scmp.eq.s32.totalorder %s375_s15, 0  ;;  %p35_p6 = scmp.eq.s32.totalorder %s32_s19, 0 }
   0xa   : > { %p399_p8 = scmp.lt.s32.totalorder %s532_s14, 2  ;;  %s126_s22 = sand.u32 1, %s520_s11  }
   0xb   : > { %p597_p7 = por %p51_p5, %p50_p4  ;;  %s390_s23 = sshll.u32 %s528_s13, 10 }
   0xc   : > { %s603_s21 = scalar_select %p35_p6, %s520_s11, %s37_s17  }
   0xd   : > { %s379_s24 = sshll.u32 %s126_s22, 6  ;;  %s610_s27 = scalar_lea.hbm %s732_s0, %s390_s23 }
   0xe   : > { %s130_s28 = scalar_lea.vmem [#allocation2], %s379_s24  ;;  %p614_p9 = pnand %p399_p8, %p590_p3 }
   0xf   : > { %s139_s29 = sshll.u32 %s130_s28, 4  ;;  %s620_s3 = scalar_lea.sflag [#allocation3], %s126_s22  ;;  %s618_s29 = int_to_ptr.vmem [resolvable:$true] %s139_s29 }
  0x10   : > { %s452_s4 = scalar_lea.hbm %s610_s27, 1024  ;;  %p454_p11 = pneg %p614_p9 }
  0x11   : > { %p453_p10 = scmp.ne.s32.totalorder %s610_s27, %s452_s4  ;;  %s457_s7 = scalar_lea.hbm %s732_s0, 2048 }
  0x12   : > { %p458_p0 = scmp.lt.u32.totalorder %s610_s27, %s732_s0  ;;  %p459_p1 = scmp.lt.u32.totalorder %s457_s7, %s452_s4 }
  0x13   : > { %p455_p12 = pnand %p454_p11, %p453_p10  ;;  %p461_p3 = scmp.lt.u32.totalorder %s452_s4, %s610_s27 }
  0x14   : > { %p460_p2 = por %p459_p1, %p458_p0 }
  0x15   : > { %p456_p13 = pneg %p455_p12 }
  0x16   : > { %p462_p4 = por %p461_p3, %p460_p2 }
  0x18   : > { %p463_p5 = pnand %p462_p4, %p456_p13 }
  0x1a   : > { %466 = shalt.err (!%p463_p5)
}
  0x1b   : > { %s467_s15 = scalar_lea.vmem %s618_s29, 1024  ;;  %s534_s17 = smov [#allocation2]  }
  0x1c   : > { %p468_p6 = scmp.ne.s32.totalorder %s618_s29, %s467_s15  ;;  %s472_s18 = sshll.u32 %s534_s17, 4  ;;  %s473_s18 = int_to_ptr.vmem [resolvable:$false] %s472_s18 }
  0x1d   : > { %s474_s19 = scalar_lea.vmem %s473_s18, 2048  ;;  %p475_p12 = scmp.lt.s32.totalorder %s618_s29, %s473_s18 }
  0x1e   : > { %p470_p8 = pnand %p468_p6, %p454_p11  ;;  %p476_p0 = scmp.lt.s32.totalorder %s474_s19, %s467_s15 }
  0x20   : > { %p471_p10 = pneg %p470_p8  ;;  %p477_p1 = por %p476_p0, %p475_p12 }
  0x22   : > { %p478_p2 = pnand %p477_p1, %p471_p10 }
  0x24   : > { %481 = shalt.err (!%p478_p2)
}
  0x25   : > { %s535_s22 = smov 256   ;;  %s536_s23 = smov 16  }
  0x26   : > { %398 = dma.hbm_to_vmem [thread:$0]  (!%p614_p9), %s610_s27, 1024, %s618_s29, %s620_s3, %s535_s22, %s535_s22, %s536_s23  }
  0x27   : > { %p382_p11 = scmp.ge.s32.totalorder %s532_s14, 1  ;;  %p147_p13 = scmp.lt.s32.totalorder %s532_s14, 3 }
  0x29   : > { %p148_p3 = pnand %p382_p11, %p147_p13 }
  0x2a   : > { %s153_s24 = sand.u32 (!%p148_p3), 1, %s516_s10  }
  0x2b   : > { %151 = sbr.rel (%p148_p3) target bundleno = 212 (0xd4), region = 24  ;;  %s383_s25 = sshll.u32 (!%p148_p3), %s153_s24, 6 }
  0x2c   : > { %s154_s26 = scalar_lea.sflag (!%p148_p3), [#allocation3], %s153_s24  ;;  %s157_s28 = scalar_lea.vmem (!%p148_p3), [#allocation2], %s383_s25 }
  0x32   : > { %507 = dma.done.wait (%p597_p7), %s154_s26, 1024  }
  0x33   : > { %509 = vsyncadd (%p597_p7), %s154_s26, 4294966272  ;;  %p184_p4 = scmp.lt.s32.totalorder %s524_s12, 1  ;;  %vm198_vm0 = vcmask 7168   ;;  %v537_v0 = vmov 0.0   ;;  %v211_v1 = vld [vmem:[%s157_s28 + $0x20] sm:$0xff]  ;;  %v212_v2 = vld [vmem:[%s157_s28 + $0x28] sm:$0xff] }
  0x34   : > { %v207_v3 = vld [vmem:[%s157_s28] sm:$0xff]  ;;  %v225_v4 = vadd.f32 %v212_v2, %v211_v1  ;;  %v208_v5 = vld [vmem:[%s157_s28 + $0x8] sm:$0xff]  ;;  %v213_v6 = vld [vmem:[%s157_s28 + $0x30] sm:$0xff]  ;;  %v250_v16 = vmax.f32 %v211_v1, %v212_v2  ;;  %v538_v17 = vmov -inf  }
  0x35   : > { %s746_s12 = smov (!%p184_p4, %s524_s12), 1  ;;  %v214_v7 = vld [vmem:[%s157_s28 + $0x38] sm:$0xff]  ;;  %v219_v8 = vadd.f32 %v208_v5, %v207_v3  ;;  %v209_v9 = vld [vmem:[%s157_s28 + $0x10] sm:$0xff]  ;;  %v244_v14 = vmax.f32 %v207_v3, %v208_v5 }
  0x36   : > { %s391_s27 = sshll.u32 %s746_s12, 5  ;;  %v210_v10 = vld [vmem:[%s157_s28 + $0x18] sm:$0xff]  ;;  %226 = vadd.xlane.f32.xlu1 %v225_v4  ;;  %v228_v11 = vadd.f32 %v214_v7, %v213_v6  ;;  %v253_v15 = vmax.f32 %v213_v6, %v214_v7 }
  0x37   : > { %s665_s3 = scalar_lea.vmem %s733_s1, %s391_s27  ;;  %220 = vadd.xlane.f32.xlu0 %v219_v8  ;;  %v222_v12 = vadd.f32 %v210_v10, %v209_v9  ;;  %v247_v13 = vmax.f32 %v209_v9, %v210_v10  ;;  %s680_s5 = scalar_lea.vmem %s734_s2, %s391_s27 }
  0x38   : > { %201 = vst.msk [vmem:[%s665_s3 + $0x10] sm:$0xff] %vm198_vm0, %v537_v0  ;;  %199 = vst.msk [vmem:[%s665_s3] sm:$0xff] %vm198_vm0, %v537_v0 }
  0x39   : > { %200 = vst.msk [vmem:[%s665_s3 + $0x8] sm:$0xff] %vm198_vm0, %v537_v0  ;;  %202 = vst.msk [vmem:[%s665_s3 + $0x18] sm:$0xff] %vm198_vm0, %v537_v0 }
  0x3a   : > { %229 = vadd.xlane.f32.xlu1 %v228_v11  ;;  %204 = vst.msk [vmem:[%s680_s5 + $0x8] sm:$0xff] %vm198_vm0, %v538_v17  ;;  %203 = vst.msk [vmem:[%s680_s5] sm:$0xff] %vm198_vm0, %v538_v17 }
  0x3b   : > { %223 = vadd.xlane.f32.xlu0 %v222_v12  ;;  %205 = vst.msk [vmem:[%s680_s5 + $0x10] sm:$0xff] %vm198_vm0, %v538_v17  ;;  %206 = vst.msk [vmem:[%s680_s5 + $0x18] sm:$0xff] %vm198_vm0, %v538_v17 }
  0x3e   : > { %248 = vmax.xlane.f32.xlu1 %v247_v13 }
  0x3f   : > { %245 = vmax.xlane.f32.xlu0 %v244_v14  ;;  %v217_v18 = vld [vmem:[%s665_s3 + $0x10] sm:$0xff]  ;;  %v215_v19 = vld [vmem:[%s665_s3] sm:$0xff] }
  0x40   : > { %v218_v24 = vld [vmem:[%s665_s3 + $0x18] sm:$0xff]  ;;  %v216_v25 = vld [vmem:[%s665_s3 + $0x8] sm:$0xff] }
  0x41   : > { %v241_v30 = vld [vmem:[%s680_s5 + $0x8] sm:$0xff]  ;;  %v240_v31 = vld [vmem:[%s680_s5] sm:$0xff] }
  0x42   : > { %254 = vmax.xlane.f32.xlu1 %v253_v15  ;;  %v243_v36 = vld [vmem:[%s680_s5 + $0x18] sm:$0xff]  ;;  %v242_v37 = vld [vmem:[%s680_s5 + $0x10] sm:$0xff] }
  0x43   : > { %251 = vmax.xlane.f32.xlu0 %v250_v16 }
  0xc3   : > { %v227_v20 = vpop.xlane.xlu1 %226 }
  0xc4   : > { %v233_v21 = vadd.f32 %v227_v20, %v217_v18  ;;  %v221_v22 = vpop.xlane.xlu0 %220 }
  0xc5   : > { %v231_v23 = vadd.f32 %v221_v22, %v215_v19 }
  0xc6   : > { %238 = vst.msk [vmem:[%s665_s3 + $0x10] sm:$0xff] %vm198_vm0, %v233_v21 }
  0xc7   : > { %236 = vst.msk [vmem:[%s665_s3] sm:$0xff] %vm198_vm0, %v231_v23  ;;  %v230_v26 = vpop.xlane.xlu1 %229 }
  0xc8   : > { %v234_v27 = vadd.f32 %v230_v26, %v218_v24  ;;  %v224_v28 = vpop.xlane.xlu0 %223 }
  0xc9   : > { %v232_v29 = vadd.f32 %v224_v28, %v216_v25 }
  0xca   : > { %239 = vst.msk [vmem:[%s665_s3 + $0x18] sm:$0xff] %vm198_vm0, %v234_v27 }
  0xcb   : > { %237 = vst.msk [vmem:[%s665_s3 + $0x8] sm:$0xff] %vm198_vm0, %v232_v29  ;;  %v249_v32 = vpop.xlane.xlu1 %248 }
  0xcc   : > { %v257_v33 = vmax.f32 %v241_v30, %v249_v32  ;;  %v246_v34 = vpop.xlane.xlu0 %245 }
  0xcd   : > { %v256_v35 = vmax.f32 %v240_v31, %v246_v34 }
  0xce   : > { %261 = vst.msk [vmem:[%s680_s5 + $0x8] sm:$0xff] %vm198_vm0, %v257_v33 }
  0xcf   : > { %260 = vst.msk [vmem:[%s680_s5] sm:$0xff] %vm198_vm0, %v256_v35  ;;  %v255_v38 = vpop.xlane.xlu1 %254 }
  0xd0   : > { %v259_v39 = vmax.f32 %v243_v36, %v255_v38  ;;  %v252_v40 = vpop.xlane.xlu0 %251 }
  0xd1   : > { %v258_v41 = vmax.f32 %v242_v37, %v252_v40 }
  0xd2   : > { %263 = vst.msk [vmem:[%s680_s5 + $0x18] sm:$0xff] %vm198_vm0, %v259_v39 }
  0xd3   : > { %262 = vst.msk [vmem:[%s680_s5 + $0x10] sm:$0xff] %vm198_vm0, %v258_v41 }
  0xd4 PF: > { %s16_s14 = sadd.s32 1, %s532_s14   ;;  %s738_s9 = smov %s516_s10 }
  0xd5   : > { %p13_p7 = scmp.ge.s32.totalorder %s16_s14, 4   ;;  %s739_s10 = smov %s520_s11 }
  0xd6   : > { %s740_s11 = smov %s603_s21  ;;  %s741_s12 = smov %s528_s13 }
  0xd7   : > { %s742_s13 = smov %s744_s16  ;;  %15 = sbr.rel (!%p13_p7) target bundleno = 4 (0x4), region = 80 }
  0xde   :  { %301 = vsyncpa [#allocation3], 1 }
  0xdf   :  { %303 = vsyncpa [#allocation3 + $0x1], 1 }

</bundles_post_ra>
